<compile_context>
chip_gen: v5e
topology: v5e:2x2
jax: 0.10.0
libtpu: 0.0.40
codegen_flags: <defaults>
</compile_context>

<pallas_src>
import jax
import jax.numpy as jnp
from jax.experimental import pallas as pl
from jax.experimental.pallas import tpu as pltpu


def _round_up(x, m):
    return ((x + m - 1) // m) * m


def reconnet_kernel(x_ref, w1_ref, b1_ref, w2_ref, b2_ref, w3_ref, b3_ref, o_ref):
    # One (TB, D_in) f32 batch tile; weights/biases are VMEM-resident.
    # In-kernel bf16 cast (hidden under MXU slack; avoids a wrapper-side pass).
    x = x_ref[...].astype(jnp.bfloat16)

    # linear1 + ReLU (bf16 MXU operands, f32 accumulate + f32 epilogue)
    h1 = jnp.dot(x, w1_ref[...], preferred_element_type=jnp.float32) + b1_ref[...]
    h1 = jnp.maximum(h1, 0.0).astype(jnp.bfloat16)

    # linear2 + ReLU
    h2 = jnp.dot(h1, w2_ref[...], preferred_element_type=jnp.float32) + b2_ref[...]
    h2 = jnp.maximum(h2, 0.0).astype(jnp.bfloat16)

    # linear3 + Sigmoid, written at the true output width D_out (f32).
    z = jnp.dot(h2, w3_ref[...], preferred_element_type=jnp.float32) + b3_ref[...]
    o_ref[...] = pl.reciprocal(1.0 + jnp.exp(-z), approx=True)


def _choose_tb(b_pad):
    # Large tiles amortize the ~0.35us/grid-step pipeline overhead; cap at
    # 1024 rows (double-buffered x/out + f32/bf16 temps stay <~2 MiB at
    # 128-wide hiddens, well inside v5e/v6e/v7x scoped-VMEM defaults).
    # Ensure >=2 grid steps when the batch allows it so the "parallel" axis
    # actually shards across v7x's two TensorCores.
    if b_pad <= 8:
        return b_pad
    return max(8, min(1024, _round_up(pl.cdiv(b_pad, 2), 8)))


def prepare_params(params):
    """Run ONCE per model: pad hidden dims to 128 lanes, cast weights to bf16.

    D_in and D_out stay unpadded (block last-dim == full array dim is legal),
    avoiding padding-inflated HBM traffic. Biases stay f32 for the f32 epilogue.
    Zero-padded hidden columns produce relu(0)=0 and contribute nothing downstream.
    """
    D_in, H1 = params["w1"].shape
    H2 = params["w2"].shape[1]
    D_out = params["w3"].shape[1]
    H1p, H2p = _round_up(H1, 128), _round_up(H2, 128)

    def pad2(a, r, c):
        return jnp.pad(a, ((0, r - a.shape[0]), (0, c - a.shape[1])))

    return {
        "w1": pad2(params["w1"], D_in, H1p).astype(jnp.bfloat16),
        "b1": pad2(params["b1"], 1, H1p),
        "w2": pad2(params["w2"], H1p, H2p).astype(jnp.bfloat16),
        "b2": pad2(params["b2"], 1, H2p),
        "w3": pad2(params["w3"], H2p, D_out).astype(jnp.bfloat16),
        "b3": params["b3"],
    }


@jax.jit
def reconnet_forward(x, pparams):
    """x: (B, D_in) float32. pparams: output of prepare_params()."""
    w1, b1 = pparams["w1"], pparams["b1"]
    w2, b2 = pparams["w2"], pparams["b2"]
    w3, b3 = pparams["w3"], pparams["b3"]

    B, D_in = x.shape
    H1p, H2p = w1.shape[1], w2.shape[1]
    D_out = w3.shape[1]

    # Pad the batch only to the 8-row sublane granule (x stays f32 in HBM);
    # the grid uses cdiv so the last tile may be ragged instead of rounding
    # the batch up to a full TB multiple.
    B_p = _round_up(max(B, 8), 8)
    x_p = jnp.pad(x, ((0, B_p - B), (0, 0)))

    TB = _choose_tb(B_p)
    grid = (pl.cdiv(B_p, TB),)

    const = lambda a: pl.BlockSpec(a.shape, lambda i: (0,) * a.ndim)

    flops = 2 * B_p * (D_in * H1p + H1p * H2p + H2p * D_out)
    bytes_accessed = (
        x_p.size * 4
        + (w1.size + w2.size + w3.size) * 2
        + (b1.size + b2.size + b3.size) * 4
        + B_p * D_out * 4
    )

    out = pl.pallas_call(
        reconnet_kernel,
        out_shape=jax.ShapeDtypeStruct((B_p, D_out), jnp.float32),
        grid=grid,
        in_specs=[
            pl.BlockSpec((TB, D_in), lambda i: (i, 0)),   # x: tiled over batch
            const(w1), const(b1),                         # weights/biases resident
            const(w2), const(b2),
            const(w3), const(b3),
        ],
        out_specs=pl.BlockSpec((TB, D_out), lambda i: (i, 0)),
        compiler_params=pltpu.CompilerParams(
            dimension_semantics=("parallel",)),
        cost_estimate=pl.CostEstimate(
            flops=flops,
            transcendentals=2 * B_p * D_out,   # exp + recip per output element
            bytes_accessed=bytes_accessed),
    )(x_p, w1, b1, w2, b2, w3, b3)

    return out[:B]   # single authoritative slice, fused in the same jit


def init_params(key, D_in, H1, H2, D_out):
    """Deterministic synthetic init (PyTorch-style uniform fan-in scaling)."""
    ks = jax.random.split(key, 6)

    def lin(kw, kb, fan_in, fan_out):
        bound = 1.0 / jnp.sqrt(jnp.float32(fan_in))
        w = jax.random.uniform(kw, (fan_in, fan_out), jnp.float32, -bound, bound)
        b = jax.random.uniform(kb, (1, fan_out), jnp.float32, -bound, bound)
        return w, b

    w1, b1 = lin(ks[0], ks[1], D_in, H1)
    w2, b2 = lin(ks[2], ks[3], H1, H2)
    w3, b3 = lin(ks[4], ks[5], H2, D_out)
    return {"w1": w1, "b1": b1, "w2": w2, "b2": b2, "w3": w3, "b3": b3}


if __name__ == "__main__":
    # Small shapes consistent with the module's forward: x is (batch, D_in).
    B, D_in, H1, H2, D_out = 8, 32, 64, 64, 16

    key = jax.random.PRNGKey(0)
    k_x, k_p = jax.random.split(key)
    x = jax.random.normal(k_x, (B, D_in), jnp.float32)
    params = init_params(k_p, D_in, H1, H2, D_out)

    pparams = prepare_params(params)        # one-time pad + bf16 cast
    y = reconnet_forward(x, pparams)
    jax.block_until_ready(y)

    # Pure-JAX f32 reference check (tolerance widened for bf16 MXU operands).
    h1 = jnp.maximum(x @ params["w1"] + params["b1"], 0.0)
    h2 = jnp.maximum(h1 @ params["w2"] + params["b2"], 0.0)
    y_ref = jax.nn.sigmoid(h2 @ params["w3"] + params["b3"])
    assert y.shape == (B, D_out)
    assert jnp.allclose(y, y_ref, atol=2e-2, rtol=2e-2)

    print("KERNEL_OK")
</pallas_src>

<mosaic_0001>
module attributes {stable_mosaic.version = 11 : i64} {
  func.func @reconnet_kernel(%arg0: i32, %arg1: memref<8x32xf32, #tpu.memory_space<vmem>>, %arg2: memref<32x128xbf16, #tpu.memory_space<vmem>>, %arg3: memref<1x128xf32, #tpu.memory_space<vmem>>, %arg4: memref<128x128xbf16, #tpu.memory_space<vmem>>, %arg5: memref<1x128xf32, #tpu.memory_space<vmem>>, %arg6: memref<128x16xbf16, #tpu.memory_space<vmem>>, %arg7: memref<1x16xf32, #tpu.memory_space<vmem>>, %arg8: memref<8x16xf32, #tpu.memory_space<vmem>>) attributes {dimension_semantics = [#tpu.dimension_semantics<parallel>], iteration_bounds = array<i64: 1>, scalar_prefetch = 0 : i64, scratch_operands = 0 : i64, tpu.core_type = #tpu.core_type<tc>, window_params = [{transform_indices = @transform_0, window_bounds = array<i64: 8, 32>}, {pipeline_mode = #tpu.pipeline_mode<synchronous>, transform_indices = @transform_1, window_bounds = array<i64: 32, 128>}, {pipeline_mode = #tpu.pipeline_mode<synchronous>, transform_indices = @transform_2, window_bounds = array<i64: 1, 128>}, {pipeline_mode = #tpu.pipeline_mode<synchronous>, transform_indices = @transform_3, window_bounds = array<i64: 128, 128>}, {pipeline_mode = #tpu.pipeline_mode<synchronous>, transform_indices = @transform_4, window_bounds = array<i64: 1, 128>}, {pipeline_mode = #tpu.pipeline_mode<synchronous>, transform_indices = @transform_5, window_bounds = array<i64: 128, 16>}, {pipeline_mode = #tpu.pipeline_mode<synchronous>, transform_indices = @transform_6, window_bounds = array<i64: 1, 16>}, {transform_indices = @transform_7, window_bounds = array<i64: 8, 16>}]} {
    %c0 = arith.constant 0 : index
    %c0_0 = arith.constant 0 : index
    %0 = vector.load %arg1[%c0, %c0_0] : memref<8x32xf32, #tpu.memory_space<vmem>>, vector<8x32xf32>
    %1 = arith.truncf %0 : vector<8x32xf32> to vector<8x32xbf16>
    %c0_1 = arith.constant 0 : index
    %c0_2 = arith.constant 0 : index
    %2 = vector.load %arg2[%c0_1, %c0_2] : memref<32x128xbf16, #tpu.memory_space<vmem>>, vector<32x128xbf16>
    %cst = arith.constant dense<0.000000e+00> : vector<8x128xf32>
    %3 = tpu.matmul %1, %2, %cst {dimension_numbers = #tpu.dot_dimension_numbers<[1], [0], [0], [1], [0, 0, 1, 1], [], []>} : vector<8x32xbf16>, vector<32x128xbf16>, vector<8x128xf32> -> vector<8x128xf32>
    %c0_3 = arith.constant 0 : index
    %c0_4 = arith.constant 0 : index
    %4 = vector.load %arg3[%c0_3, %c0_4] : memref<1x128xf32, #tpu.memory_space<vmem>>, vector<1x128xf32>
    %5 = vector.broadcast %4 : vector<1x128xf32> to vector<8x128xf32>
    %6 = arith.addf %3, %5 : vector<8x128xf32>
    %cst_5 = arith.constant 0.000000e+00 : f32
    %7 = vector.broadcast %cst_5 : f32 to vector<8x128xf32>
    %8 = arith.maximumf %6, %7 : vector<8x128xf32>
    %9 = arith.truncf %8 : vector<8x128xf32> to vector<8x128xbf16>
    %c0_6 = arith.constant 0 : index
    %c0_7 = arith.constant 0 : index
    %10 = vector.load %arg4[%c0_6, %c0_7] : memref<128x128xbf16, #tpu.memory_space<vmem>>, vector<128x128xbf16>
    %cst_8 = arith.constant dense<0.000000e+00> : vector<8x128xf32>
    %11 = tpu.matmul %9, %10, %cst_8 {dimension_numbers = #tpu.dot_dimension_numbers<[1], [0], [0], [1], [0, 0, 1, 1], [], []>} : vector<8x128xbf16>, vector<128x128xbf16>, vector<8x128xf32> -> vector<8x128xf32>
    %c0_9 = arith.constant 0 : index
    %c0_10 = arith.constant 0 : index
    %12 = vector.load %arg5[%c0_9, %c0_10] : memref<1x128xf32, #tpu.memory_space<vmem>>, vector<1x128xf32>
    %13 = vector.broadcast %12 : vector<1x128xf32> to vector<8x128xf32>
    %14 = arith.addf %11, %13 : vector<8x128xf32>
    %cst_11 = arith.constant 0.000000e+00 : f32
    %15 = vector.broadcast %cst_11 : f32 to vector<8x128xf32>
    %16 = arith.maximumf %14, %15 : vector<8x128xf32>
    %17 = arith.truncf %16 : vector<8x128xf32> to vector<8x128xbf16>
    %c0_12 = arith.constant 0 : index
    %c0_13 = arith.constant 0 : index
    %18 = vector.load %arg6[%c0_12, %c0_13] : memref<128x16xbf16, #tpu.memory_space<vmem>>, vector<128x16xbf16>
    %cst_14 = arith.constant dense<0.000000e+00> : vector<8x16xf32>
    %19 = tpu.matmul %17, %18, %cst_14 {dimension_numbers = #tpu.dot_dimension_numbers<[1], [0], [0], [1], [0, 0, 1, 1], [], []>} : vector<8x128xbf16>, vector<128x16xbf16>, vector<8x16xf32> -> vector<8x16xf32>
    %c0_15 = arith.constant 0 : index
    %c0_16 = arith.constant 0 : index
    %20 = vector.load %arg7[%c0_15, %c0_16] : memref<1x16xf32, #tpu.memory_space<vmem>>, vector<1x16xf32>
    %21 = vector.broadcast %20 : vector<1x16xf32> to vector<8x16xf32>
    %22 = arith.addf %19, %21 : vector<8x16xf32>
    %cst_17 = arith.constant 0.000000e+00 : f32
    %23 = vector.broadcast %cst_17 : f32 to vector<8x16xf32>
    %24 = arith.subf %23, %22 : vector<8x16xf32>
    %25 = math.exp %24 : vector<8x16xf32>
    %cst_18 = arith.constant 1.000000e+00 : f32
    %26 = vector.broadcast %cst_18 : f32 to vector<8x16xf32>
    %27 = arith.addf %26, %25 : vector<8x16xf32>
    %28 = tpu.reciprocal %27 {approx = true} : vector<8x16xf32> -> vector<8x16xf32>
    %c0_19 = arith.constant 0 : index
    %c0_20 = arith.constant 0 : index
    %29 = vector.load %arg8[%c0_19, %c0_20] : memref<8x16xf32, #tpu.memory_space<vmem>>, vector<8x16xf32>
    tpu.vector_store %arg8[%c0_19, %c0_20], %28 {strides = array<i32>} : memref<8x16xf32, #tpu.memory_space<vmem>>, vector<8x16xf32>,
    return
  }
  func.func @transform_0(%arg0: i32) -> (i32, i32) {
    %c0_i32 = arith.constant 0 : i32
    %c0_i32_0 = arith.constant 0 : i32
    return %arg0, %c0_i32 : i32, i32
  }
  func.func @transform_1(%arg0: i32) -> (i32, i32) {
    %c0_i32 = arith.constant 0 : i32
    %c0_i32_0 = arith.constant 0 : i32
    %c0_i32_1 = arith.constant 0 : i32
    return %c0_i32, %c0_i32_0 : i32, i32
  }
  func.func @transform_2(%arg0: i32) -> (i32, i32) {
    %c0_i32 = arith.constant 0 : i32
    %c0_i32_0 = arith.constant 0 : i32
    %c0_i32_1 = arith.constant 0 : i32
    return %c0_i32, %c0_i32_0 : i32, i32
  }
  func.func @transform_3(%arg0: i32) -> (i32, i32) {
    %c0_i32 = arith.constant 0 : i32
    %c0_i32_0 = arith.constant 0 : i32
    %c0_i32_1 = arith.constant 0 : i32
    return %c0_i32, %c0_i32_0 : i32, i32
  }
  func.func @transform_4(%arg0: i32) -> (i32, i32) {
    %c0_i32 = arith.constant 0 : i32
    %c0_i32_0 = arith.constant 0 : i32
    %c0_i32_1 = arith.constant 0 : i32
    return %c0_i32, %c0_i32_0 : i32, i32
  }
  func.func @transform_5(%arg0: i32) -> (i32, i32) {
    %c0_i32 = arith.constant 0 : i32
    %c0_i32_0 = arith.constant 0 : i32
    %c0_i32_1 = arith.constant 0 : i32
    return %c0_i32, %c0_i32_0 : i32, i32
  }
  func.func @transform_6(%arg0: i32) -> (i32, i32) {
    %c0_i32 = arith.constant 0 : i32
    %c0_i32_0 = arith.constant 0 : i32
    %c0_i32_1 = arith.constant 0 : i32
    return %c0_i32, %c0_i32_0 : i32, i32
  }
  func.func @transform_7(%arg0: i32) -> (i32, i32) {
    %c0_i32 = arith.constant 0 : i32
    %c0_i32_0 = arith.constant 0 : i32
    return %arg0, %c0_i32 : i32, i32
  }
}

</mosaic_0001>

<bundles_post_ra>
// kernel: reconnet_forward.1
= control target key start
LH: loop header
LB: loop body
LE: loop exit
PB: predicated region body
PF: predicated region fallthrough
CT: control target
= control target key end

     0   :  { %12 = vsyncpa [#allocation3], 0  ;;  %s537_s0 = inlined_call_operand.vmem [shape: f32[8,32], index: 0, kind: input, shape index: {}]   ;;  %s538_s1 = inlined_call_operand.hbm [shape: bf16[32,128], index: 1, kind: input, shape index: {}]   ;;  %s539_s2 = inlined_call_operand.vmem [shape: f32[1,128], index: 2, kind: input, shape index: {}]   ;;  %s540_s3 = inlined_call_operand.vmem [shape: bf16[128,128], index: 3, kind: input, shape index: {}]   ;;  %s541_s4 = inlined_call_operand.vmem [shape: f32[1,128], index: 4, kind: input, shape index: {}]   ;;  %s542_s5 = inlined_call_operand.vmem [shape: bf16[128,16], index: 5, kind: input, shape index: {}]   ;;  %s543_s6 = inlined_call_operand.vmem [shape: f32[1,16], index: 6, kind: input, shape index: {}]   ;;  %s544_s7 = inlined_call_operand.hbm [shape: f32[8,16], index: 7, kind: output, shape index: {}]  }
   0x1   :  { %13 = vsyncpa [#allocation4], 0  ;;  %s20_s26 = sshll.u32 %s538_s1, 4  ;;  %s427_s27 = smov [#allocation2]   ;;  %s21_s26 = int_to_ptr.hbm [resolvable:$true] %s20_s26 }
   0x2   :  { %s22_s28 = sshll.u32 %s427_s27, 4  ;;  %s428_s29 = smov 64   ;;  %s23_s28 = int_to_ptr.vmem [resolvable:$true] %s22_s28 }
   0x3   :  { %s429_s30 = smov 4  }
   0x4   :  { %28 = dma.hbm_to_vmem [thread:$0]  %s21_s26, 256, %s23_s28, [#allocation3], %s428_s29, %s428_s29, %s429_s30  }
   0x5   :  { %423 = dma.done.wait [#allocation3], 256  }
   0x6   :  { %424 = vsyncadd [#allocation3], 4294967040  ;;  %v347_v0 = vld [vmem:[#allocation2 + $0x8] sm:$0xff]  ;;  %v355_v1 = vld [vmem:[%s540_s3 + $0x38] sm:$0xff]  ;;  %vm66_vm0 = vcmask 261120   ;;  %s263_s21 = sshll.u32 %s544_s7, 4  ;;  %s264_s21 = int_to_ptr.hbm [resolvable:$true] %s263_s21 }
   0x7   :  { %76 = vmatpush.bf16.msra.mxu0 %v347_v0  ;;  %v346_v2 = vld [vmem:[#allocation2] sm:$0xff]  ;;  %153 = vmatpush.bf16.msra.mxu1 %v355_v1  ;;  %v354_v4 = vld [vmem:[%s540_s3 + $0x30] sm:$0xff]  ;;  %v353_v6 = vld [vmem:[%s540_s3 + $0x28] sm:$0xff]  ;;  %vm254_vm1 = vcmask 130048  }
   0x8   :  { %v44_v3 = vld [vmem:[%s537_s0] sm:$0xff]  ;;  %v351_v8 = vld [vmem:[%s540_s3 + $0x18] sm:$0xff]  ;;  %v350_v9 = vld [vmem:[%s540_s3 + $0x10] sm:$0xff] }
   0x9   :  { %v45_v5 = vpack.c.bf16 %v44_v3, %v44_v3  ;;  %v352_v7 = vld [vmem:[%s540_s3 + $0x20] sm:$0xff]  ;;  %v349_v10 = vld [vmem:[%s540_s3 + $0x8] sm:$0xff]  ;;  %v363_v12 = vld [vmem:[%s542_s5 + $0x38] sm:$0xff] }
   0xa   :  { %v348_v11 = vld [vmem:[%s540_s3] sm:$0xff]  ;;  %236 = vmatpush.bf16.msra.mxu2 %v363_v12  ;;  %v362_v13 = vld [vmem:[%s542_s5 + $0x30] sm:$0xff]  ;;  %v361_v14 = vld [vmem:[%s542_s5 + $0x28] sm:$0xff] }
   0xb   :  { %77 = vmatpush.bf16.msra.mxu0 %v346_v2  ;;  %154 = vmatpush.bf16.msra.mxu1 %v354_v4  ;;  %v360_v15 = vld [vmem:[%s542_s5 + $0x20] sm:$0xff]  ;;  %v359_v16 = vld [vmem:[%s542_s5 + $0x18] sm:$0xff]  ;;  %v358_v17 = vld [vmem:[%s542_s5 + $0x10] sm:$0xff] }
   0xc   :  { %v368_v18 = vld [vmem:[%s539_s2] ss:$0 sm:$0xff]  ;;  %v357_v24 = vld [vmem:[%s542_s5 + $0x8] sm:$0xff] }
   0xd   :  { %v356_v25 = vld [vmem:[%s542_s5] sm:$0xff] }
   0xe   :  { %281 = vmatmul.msk.bf16.vlgmr.msra.gmra.mxu0 %vm66_vm0, %v45_v5  ;;  %237 = vmatpush.bf16.msra.mxu2 %v362_v13  ;;  %v369_v26 = vld [vmem:[%s541_s4] ss:$0 sm:$0xff]  ;;  %s430_s4 = smov [#allocation5]  }
   0xf   :  { %155 = vmatpush.bf16.msra.mxu1 %v353_v6  ;;  %v370_v32 = vld [vmem:[%s543_s6] ss:$0 sm:$0xff]  ;;  %s261_s5 = sshll.u32 %s430_s4, 4  ;;  %s262_s5 = int_to_ptr.vmem [resolvable:$true] %s261_s5 }
  0x12   :  { %238 = vmatpush.bf16.msra.mxu2 %v361_v14 }
  0x13   :  { %156 = vmatpush.bf16.msra.mxu1 %v352_v7 }
  0x16   :  { %239 = vmatpush.bf16.msra.mxu2 %v360_v15 }
  0x17   :  { %157 = vmatpush.bf16.msra.mxu1 %v351_v8 }
  0x1a   :  { %240 = vmatpush.bf16.msra.mxu2 %v359_v16 }
  0x1b   :  { %158 = vmatpush.bf16.msra.mxu1 %v350_v9 }
  0x1e   :  { %241 = vmatpush.bf16.msra.mxu2 %v358_v17 }
  0x1f   :  { %159 = vmatpush.bf16.msra.mxu1 %v349_v10 }
  0x22   :  { %242 = vmatpush.bf16.msra.mxu2 %v357_v24 }
  0x23   :  { %160 = vmatpush.bf16.msra.mxu1 %v348_v11 }
  0x26   :  { %243 = vmatpush.bf16.msra.mxu2 %v356_v25 }
  0x8b   :  { %v79_v19 = vpop.f32.mrf.mxu0 }
  0x8c   :  { %v80_v20 = vadd.f32 %v368_v18, %v79_v19 }
  0x8e   :  { %v83_v21 = vmax.f32 %v80_v20, 0.0 }
  0x90   :  { %v84_v22 = vpack.c.bf16 %v83_v21, %v83_v21 }
  0x92   :  { %161 = vmatmul.bf16.vlgmr.msra.gmra.mxu1 %v84_v22 }
  0x93   :  { %v81_v23 = vpop.f32.mrf.mxu0 }
 0x10f   :  { %v162_v27 = vpop.f32.mrf.mxu1 }
 0x110   :  { %v163_v28 = vadd.f32 %v369_v26, %v162_v27 }
 0x112   :  { %v166_v29 = vmax.f32 %v163_v28, 0.0 }
 0x114   :  { %v167_v30 = vpack.c.bf16 %v166_v29, %v166_v29 }
 0x116   :  { %244 = vmatmul.bf16.vlgmr.msra.gmra.mxu2 %v167_v30 }
 0x117   :  { %v164_v31 = vpop.f32.mrf.mxu1 }
 0x199   :  { %v245_v33 = vpop.f32.mrf.mxu2 }
 0x19a   :  { %v246_v34 = vadd.f32 %v370_v32, %v245_v33 }
 0x19c   :  { %v249_v35 = vsub.f32 0.0, %v246_v34 }
 0x19e   :  { %v250_v36 = vmul.f32 1.442695, %v249_v35 }
 0x1a0   :  { %371 = vpow2.f32 %v250_v36 }
 0x1a1   :  { %v247_v37 = vpop.f32.mrf.mxu2 }
 0x1a6   :  { %v372_v38 = vpop.eup %371 }
 0x1a7   :  { %v252_v39 = vadd.f32 1.0, %v372_v38 }
 0x1a9   :  { %373 = vrcp.f32 %v252_v39 }
 0x1af   :  { %v374_v40 = vpop.eup %373 }
 0x1b0   :  { %255 = vst.msk [vmem:[#allocation5] sm:$0xff] %vm254_vm1, %v374_v40 }
 0x1b1   :  { %266 = dma.vmem_to_hbm [thread:$0]  %s262_s5, 128, %s264_s21, [#allocation4]  }
 0x1b2   :  { %425 = dma.done.wait [#allocation4], 128  }
 0x1b3   :  { %426 = vsyncadd [#allocation4], 4294967168 }
 0x1b4   :  { %271 = vsyncpa [#allocation3], 1 }
 0x1b5   :  { %272 = vsyncpa [#allocation4], 1 }

</bundles_post_ra>
